<compile_context>
chip_gen: v5e
topology: v5e:2x2
jax: 0.10.0
libtpu: 0.0.40
codegen_flags: <defaults>
</compile_context>

<pallas_src>
import functools

import jax
import jax.numpy as jnp
from jax.experimental import pallas as pl
from jax.experimental.pallas import tpu as pltpu


COMPUTE_DTYPE = jnp.bfloat16  # MXU input dtype; accumulation is always f32.
_LANE = 128


def _round_up(x, m):
    return ((x + m - 1) // m) * m


def _vmem_limit_bytes():
    """Physical VMEM minus ~16 MiB headroom; v7x-safe fallback if query fails."""
    try:
        cap = int(pltpu.get_tpu_info().vmem_capacity_bytes)
    except Exception:
        cap = 64 * 1024 * 1024  # v7x per-TC physical (smallest of v5e/v6e/v7x)
    return max(cap - 16 * 1024 * 1024, 32 * 1024 * 1024)


# ---------------------------------------------------------------------------
# In-kernel SAGEConv math (shared by fused + tiled kernels)
# ---------------------------------------------------------------------------

def _sage_layer(a, inv_deg, x, w_cat, b, *, agg_first):
    """out = lin_l(mean_agg(x)) + lin_r(x) + b  (PyG SAGEConv, bias on lin_l).

    agg_first=True : w_cat = concat([Wl, Wr], axis=0) -> [agg, x] @ w_cat  (K=2*Fin)
    agg_first=False: w_cat = concat([Wl, Wr], axis=1) -> A@(x@Wl)*invd + x@Wr
    All dots accumulate in f32 on the MXU; epilogue (scale/bias/add) is f32 VPU.
    """
    cdt = x.dtype
    if agg_first:
        agg = jnp.dot(a, x, preferred_element_type=jnp.float32) * inv_deg
        cat = jnp.concatenate([agg.astype(cdt), x], axis=-1)
        out = jnp.dot(cat, w_cat, preferred_element_type=jnp.float32)
    else:
        f_out = w_cat.shape[1] // 2
        xw = jnp.dot(x, w_cat, preferred_element_type=jnp.float32)  # [N, 2*Fout]
        neigh = jnp.dot(a, xw[:, :f_out].astype(cdt),
                        preferred_element_type=jnp.float32) * inv_deg
        out = neigh + xw[:, f_out:]
    return out + b


# ---------------------------------------------------------------------------
# Fused two-layer kernel (A resident in VMEM, no grid, no intermediate scratch)
# ---------------------------------------------------------------------------

def _graphsage_fused_kernel(a_ref, invd_ref, x_ref, wcat1_ref, b1_ref,
                            wcat2_ref, b2_ref, o_ref,
                            *, l1_agg_first, l2_agg_first):
    a = a_ref[...]          # [Np, Np] bf16 edge counts
    invd = invd_ref[...]    # [Np, 1]  f32 1/deg (0 for isolated/padded rows)

    # ---- layer 1: SAGEConv + ReLU ----
    h = _sage_layer(a, invd, x_ref[...], wcat1_ref[...], b1_ref[...],
                    agg_first=l1_agg_first)
    h = jnp.maximum(h, 0.0).astype(COMPUTE_DTYPE)  # stays on-chip, no scratch store

    # ---- layer 2: SAGEConv (no activation) ----
    out = _sage_layer(a, invd, h, wcat2_ref[...], b2_ref[...],
                      agg_first=l2_agg_first)
    o_ref[...] = out.astype(o_ref.dtype)


# ---------------------------------------------------------------------------
# Row-tiled single-layer kernel (large-graph fallback, megacore-friendly)
# ---------------------------------------------------------------------------

def _sage_layer_tiled_kernel(a_ref, invd_ref, xfull_ref, xtile_ref,
                             wcat_ref, b_ref, o_ref, *, relu):
    # a_ref: [TM, Np] bf16 counts; invd_ref: [TM, 1] f32; xfull_ref: [Np, Fin];
    # xtile_ref: [TM, Fin]; wcat_ref: [2*Fin, Fout]; b_ref: [1, Fout]; o_ref: [TM, Fout]
    agg = jnp.dot(a_ref[...], xfull_ref[...],
                  preferred_element_type=jnp.float32) * invd_ref[...]
    cat = jnp.concatenate([agg.astype(xtile_ref.dtype), xtile_ref[...]], axis=-1)
    out = jnp.dot(cat, wcat_ref[...], preferred_element_type=jnp.float32) + b_ref[...]
    if relu:
        out = jnp.maximum(out, 0.0)
    o_ref[...] = out.astype(o_ref.dtype)


def _sage_layer_tiled(a, inv_deg, x, w_cat, b, *, relu, out_dtype, tile_m):
    n_pad = a.shape[0]
    f_in = x.shape[1]
    f_out = w_cat.shape[1]
    flops = 2 * n_pad * (n_pad * f_in + 2 * f_in * f_out)
    bytes_accessed = int(2 * n_pad * n_pad + 4 * n_pad + 2 * n_pad * f_in * 2
                         + 2 * w_cat.size + 4 * b.size
                         + n_pad * f_out * jnp.dtype(out_dtype).itemsize)
    return pl.pallas_call(
        functools.partial(_sage_layer_tiled_kernel, relu=relu),
        out_shape=jax.ShapeDtypeStruct((n_pad, f_out), out_dtype),
        grid=(n_pad // tile_m,),
        in_specs=[
            pl.BlockSpec((tile_m, n_pad), lambda i: (i, 0)),    # A row tile
            pl.BlockSpec((tile_m, 1), lambda i: (i, 0)),        # 1/deg row tile
            pl.BlockSpec((n_pad, f_in), lambda i: (0, 0)),      # full X (aggregation)
            pl.BlockSpec((tile_m, f_in), lambda i: (i, 0)),     # X row tile (root term)
            pl.BlockSpec((2 * f_in, f_out), lambda i: (0, 0)),  # stacked [Wl; Wr]
            pl.BlockSpec((1, f_out), lambda i: (0, 0)),         # bias
        ],
        out_specs=pl.BlockSpec((tile_m, f_out), lambda i: (i, 0)),
        compiler_params=pltpu.CompilerParams(
            dimension_semantics=("parallel",),
            vmem_limit_bytes=_vmem_limit_bytes()),
        cost_estimate=pl.CostEstimate(flops=flops, transcendentals=0,
                                      bytes_accessed=bytes_accessed),
    )(a, inv_deg, x, x, w_cat, b)


# ---------------------------------------------------------------------------
# Wrapper
# ---------------------------------------------------------------------------

def precompute_graph(edge_index, num_nodes, n_pad=None):
    """Per-graph precompute (cache across forward calls):
    padded bf16 edge-count adjacency A[i, j] = #edges j -> i, and f32 1/in-degree.
    Padded rows/cols are zero, so they contribute nothing."""
    if n_pad is None:
        n_pad = _round_up(num_nodes, _LANE)
    src, dst = edge_index[0], edge_index[1]
    a = jnp.zeros((n_pad, n_pad), jnp.float32).at[dst, src].add(1.0)
    deg = jnp.zeros((n_pad, 1), jnp.float32).at[dst, 0].add(1.0)
    inv_deg = jnp.where(deg > 0, 1.0 / jnp.maximum(deg, 1.0), 0.0)
    return a.astype(COMPUTE_DTYPE), inv_deg


def graphsage_forward(x, edge_index, params, graph=None, *, force_tiled=False):
    n, f_in = x.shape
    hidden = params["w_l1"].shape[1]
    n_cls = params["w_l2"].shape[1]

    # Pad to lane-dense / MXU-friendly sizes (multiples of 128).
    n_pad = _round_up(n, _LANE)
    fi_pad = _round_up(f_in, _LANE)
    fh_pad = _round_up(hidden, _LANE)
    fo_pad = _round_up(n_cls, _LANE)

    if graph is None:
        graph = precompute_graph(edge_index, n, n_pad)  # pass `graph` to cache
    a_cnt, inv_deg = graph

    def pad2(m, rows, cols, dtype=None):
        out = jnp.pad(m, ((0, rows - m.shape[0]), (0, cols - m.shape[1])))
        return out if dtype is None else out.astype(dtype)

    x_p = pad2(x, n_pad, fi_pad, COMPUTE_DTYPE)
    b1 = pad2(params["b1"], 1, fh_pad)   # f32
    b2 = pad2(params["b2"], 1, fo_pad)   # f32

    # Per layer, decide (on PADDED widths) whether the NxN aggregation contracts
    # at the input or output feature width, then stack [Wl; Wr] so the
    # neighbor+root transform is a single K=2*F MXU dot.
    l1_agg_first = fi_pad <= fh_pad
    l2_agg_first = fh_pad <= fo_pad

    def stack_w(wl, wr, fin_p, fout_p, agg_first):
        wl = pad2(wl, fin_p, fout_p, COMPUTE_DTYPE)
        wr = pad2(wr, fin_p, fout_p, COMPUTE_DTYPE)
        return jnp.concatenate([wl, wr], axis=0 if agg_first else 1)

    wcat1 = stack_w(params["w_l1"], params["w_r1"], fi_pad, fh_pad, l1_agg_first)
    wcat2 = stack_w(params["w_l2"], params["w_r2"], fh_pad, fo_pad, l2_agg_first)

    vmem_limit = _vmem_limit_bytes()
    # Rough fused-kernel footprint: A + 1/deg + X + out + f32/bf16 temporaries.
    fmax = max(fi_pad, fh_pad, fo_pad)
    est_bytes = (2 * n_pad * n_pad + 4 * n_pad + 2 * n_pad * fi_pad
                 + 4 * n_pad * fo_pad + 24 * n_pad * fmax
                 + 2 * (wcat1.size + wcat2.size))
    use_tiled = force_tiled or est_bytes > vmem_limit

    if not use_tiled:
        flops = 2 * n_pad * (n_pad * fi_pad + 2 * fi_pad * fh_pad
                             + n_pad * fh_pad + 2 * fh_pad * fo_pad)
        bytes_accessed = int(2 * n_pad * n_pad + 4 * n_pad + 2 * n_pad * fi_pad
                             + 2 * (wcat1.size + wcat2.size)
                             + 4 * (b1.size + b2.size) + 4 * n_pad * fo_pad)
        kernel = functools.partial(_graphsage_fused_kernel,
                                   l1_agg_first=l1_agg_first,
                                   l2_agg_first=l2_agg_first)
        out = pl.pallas_call(
            kernel,
            out_shape=jax.ShapeDtypeStruct((n_pad, fo_pad), jnp.float32),
            in_specs=[pl.BlockSpec(memory_space=pltpu.VMEM)] * 7,
            out_specs=pl.BlockSpec(memory_space=pltpu.VMEM),
            compiler_params=pltpu.CompilerParams(vmem_limit_bytes=vmem_limit),
            cost_estimate=pl.CostEstimate(flops=flops, transcendentals=0,
                                          bytes_accessed=bytes_accessed),
        )(a_cnt, inv_deg, x_p, wcat1, b1, wcat2, b2)
    else:
        # Large-graph fallback: two row-tiled calls; h round-trips HBM in bf16.
        tile_m = 512 if n_pad % 512 == 0 else (256 if n_pad % 256 == 0 else 128)
        # Tiled path always uses the agg-first formulation (stack along axis 0).
        wcat1_t = wcat1 if l1_agg_first else stack_w(
            params["w_l1"], params["w_r1"], fi_pad, fh_pad, True)
        wcat2_t = wcat2 if l2_agg_first else stack_w(
            params["w_l2"], params["w_r2"], fh_pad, fo_pad, True)
        h = _sage_layer_tiled(a_cnt, inv_deg, x_p, wcat1_t, b1,
                              relu=True, out_dtype=COMPUTE_DTYPE, tile_m=tile_m)
        out = _sage_layer_tiled(a_cnt, inv_deg, h, wcat2_t, b2,
                                relu=False, out_dtype=jnp.float32, tile_m=tile_m)

    return out[:n, :n_cls]


def init_params(key, input_dim, hidden_dim, num_classes):
    ks = jax.random.split(key, 6)

    def glorot(k, fan_in, fan_out):
        lim = (6.0 / (fan_in + fan_out)) ** 0.5
        # stored as [Fin, Fout] so the kernel does X @ W directly
        return jax.random.uniform(k, (fan_in, fan_out), jnp.float32, -lim, lim)

    return {
        "w_l1": glorot(ks[0], input_dim, hidden_dim),
        "w_r1": glorot(ks[1], input_dim, hidden_dim),
        "b1": jnp.zeros((1, hidden_dim), jnp.float32),
        "w_l2": glorot(ks[2], hidden_dim, num_classes),
        "w_r2": glorot(ks[3], hidden_dim, num_classes),
        "b2": jnp.zeros((1, num_classes), jnp.float32),
    }


if __name__ == "__main__":
    key = jax.random.PRNGKey(0)
    N, INPUT_DIM, HIDDEN_DIM, NUM_CLASSES = 16, 8, 32, 4

    k_x, k_p = jax.random.split(key)
    x = jax.random.normal(k_x, (N, INPUT_DIM), jnp.float32)

    # deterministic small graph: directed ring + skip-by-3 edges
    src = jnp.concatenate([jnp.arange(N), jnp.arange(N)])
    dst = jnp.concatenate([(jnp.arange(N) + 1) % N, (jnp.arange(N) + 3) % N])
    edge_index = jnp.stack([src, dst]).astype(jnp.int32)  # [2, num_edges]

    params = init_params(k_p, INPUT_DIM, HIDDEN_DIM, NUM_CLASSES)

    # Precompute the padded adjacency counts + 1/deg ONCE (cached across calls).
    graph = precompute_graph(edge_index, N)

    fwd = jax.jit(graphsage_forward, static_argnames=("force_tiled",))

    # Default path: single fused two-layer kernel (A resident in VMEM).
    out = fwd(x, edge_index, params, graph)
    jax.block_until_ready(out)
    assert out.shape == (N, NUM_CLASSES)

    # Also exercise the row-tiled large-graph fallback and check agreement.
    out_tiled = fwd(x, edge_index, params, graph, force_tiled=True)
    jax.block_until_ready(out_tiled)
    assert out_tiled.shape == (N, NUM_CLASSES)
    assert jnp.allclose(out, out_tiled, rtol=2e-2, atol=2e-2)

    print("KERNEL_OK")
</pallas_src>

<mosaic_0001>
module attributes {stable_mosaic.version = 11 : i64} {
  func.func @_graphsage_fused_kernel(%arg0: memref<128x128xbf16, #tpu.memory_space<vmem>>, %arg1: memref<128x1xf32, #tpu.memory_space<vmem>>, %arg2: memref<128x128xbf16, #tpu.memory_space<vmem>>, %arg3: memref<256x128xbf16, #tpu.memory_space<vmem>>, %arg4: memref<1x128xf32, #tpu.memory_space<vmem>>, %arg5: memref<256x128xbf16, #tpu.memory_space<vmem>>, %arg6: memref<1x128xf32, #tpu.memory_space<vmem>>, %arg7: memref<128x128xf32, #tpu.memory_space<vmem>>) attributes {dimension_semantics = [], scalar_prefetch = 0 : i64, scratch_operands = 0 : i64, tpu.core_type = #tpu.core_type<tc>} {
    %c0 = arith.constant 0 : index
    %c0_0 = arith.constant 0 : index
    %0 = vector.load %arg0[%c0, %c0_0] : memref<128x128xbf16, #tpu.memory_space<vmem>>, vector<128x128xbf16>
    %c0_1 = arith.constant 0 : index
    %c0_2 = arith.constant 0 : index
    %1 = vector.load %arg1[%c0_1, %c0_2] : memref<128x1xf32, #tpu.memory_space<vmem>>, vector<128x1xf32>
    %c0_3 = arith.constant 0 : index
    %c0_4 = arith.constant 0 : index
    %2 = vector.load %arg2[%c0_3, %c0_4] : memref<128x128xbf16, #tpu.memory_space<vmem>>, vector<128x128xbf16>
    %c0_5 = arith.constant 0 : index
    %c0_6 = arith.constant 0 : index
    %3 = vector.load %arg3[%c0_5, %c0_6] : memref<256x128xbf16, #tpu.memory_space<vmem>>, vector<256x128xbf16>
    %c0_7 = arith.constant 0 : index
    %c0_8 = arith.constant 0 : index
    %4 = vector.load %arg4[%c0_7, %c0_8] : memref<1x128xf32, #tpu.memory_space<vmem>>, vector<1x128xf32>
    %cst = arith.constant dense<0.000000e+00> : vector<128x128xf32>
    %5 = tpu.matmul %0, %2, %cst {dimension_numbers = #tpu.dot_dimension_numbers<[1], [0], [0], [1], [0, 0, 1, 1], [], []>} : vector<128x128xbf16>, vector<128x128xbf16>, vector<128x128xf32> -> vector<128x128xf32>
    %6 = vector.broadcast %1 : vector<128x1xf32> to vector<128x128xf32>
    %7 = arith.mulf %5, %6 : vector<128x128xf32>
    %8 = arith.truncf %7 : vector<128x128xf32> to vector<128x128xbf16>
    %9 = tpu.concatenate %8, %2 in 1 : vector<128x128xbf16>, vector<128x128xbf16> -> vector<128x256xbf16>
    %cst_9 = arith.constant dense<0.000000e+00> : vector<128x128xf32>
    %10 = tpu.matmul %9, %3, %cst_9 {dimension_numbers = #tpu.dot_dimension_numbers<[1], [0], [0], [1], [0, 0, 1, 1], [], []>} : vector<128x256xbf16>, vector<256x128xbf16>, vector<128x128xf32> -> vector<128x128xf32>
    %11 = vector.broadcast %4 : vector<1x128xf32> to vector<128x128xf32>
    %12 = arith.addf %10, %11 : vector<128x128xf32>
    %cst_10 = arith.constant 0.000000e+00 : f32
    %13 = vector.broadcast %cst_10 : f32 to vector<128x128xf32>
    %14 = arith.maximumf %12, %13 : vector<128x128xf32>
    %15 = arith.truncf %14 : vector<128x128xf32> to vector<128x128xbf16>
    %c0_11 = arith.constant 0 : index
    %c0_12 = arith.constant 0 : index
    %16 = vector.load %arg5[%c0_11, %c0_12] : memref<256x128xbf16, #tpu.memory_space<vmem>>, vector<256x128xbf16>
    %c0_13 = arith.constant 0 : index
    %c0_14 = arith.constant 0 : index
    %17 = vector.load %arg6[%c0_13, %c0_14] : memref<1x128xf32, #tpu.memory_space<vmem>>, vector<1x128xf32>
    %cst_15 = arith.constant dense<0.000000e+00> : vector<128x128xf32>
    %18 = tpu.matmul %0, %15, %cst_15 {dimension_numbers = #tpu.dot_dimension_numbers<[1], [0], [0], [1], [0, 0, 1, 1], [], []>} : vector<128x128xbf16>, vector<128x128xbf16>, vector<128x128xf32> -> vector<128x128xf32>
    %19 = vector.broadcast %1 : vector<128x1xf32> to vector<128x128xf32>
    %20 = arith.mulf %18, %19 : vector<128x128xf32>
    %21 = arith.truncf %20 : vector<128x128xf32> to vector<128x128xbf16>
    %22 = tpu.concatenate %21, %15 in 1 : vector<128x128xbf16>, vector<128x128xbf16> -> vector<128x256xbf16>
    %cst_16 = arith.constant dense<0.000000e+00> : vector<128x128xf32>
    %23 = tpu.matmul %22, %16, %cst_16 {dimension_numbers = #tpu.dot_dimension_numbers<[1], [0], [0], [1], [0, 0, 1, 1], [], []>} : vector<128x256xbf16>, vector<256x128xbf16>, vector<128x128xf32> -> vector<128x128xf32>
    %24 = vector.broadcast %17 : vector<1x128xf32> to vector<128x128xf32>
    %25 = arith.addf %23, %24 : vector<128x128xf32>
    %c0_17 = arith.constant 0 : index
    %c0_18 = arith.constant 0 : index
    %26 = vector.load %arg7[%c0_17, %c0_18] : memref<128x128xf32, #tpu.memory_space<vmem>>, vector<128x128xf32>
    tpu.vector_store %arg7[%c0_17, %c0_18], %25 {strides = array<i32>} : memref<128x128xf32, #tpu.memory_space<vmem>>, vector<128x128xf32>,
    return
  }
}

</mosaic_0001>

<bundles_post_ra>
// kernel: graphsage_forward.1
= control target key start
LH: loop header
LB: loop body
LE: loop exit
PB: predicated region body
PF: predicated region fallthrough
CT: control target
= control target key end

     0   :  { %v1330_v1 = vmov 0   ;;  %s1805_s2 = inlined_call_operand.vmem [shape: bf16[128,128], index: 2, kind: input, shape index: {}]   ;;  %s1806_s1 = inlined_call_operand.vmem [shape: f32[128,1], index: 1, kind: input, shape index: {}]   ;;  %s1807_s0 = inlined_call_operand.vmem [shape: bf16[128,128], index: 0, kind: input, shape index: {}]   ;;  %s1808_s3 = inlined_call_operand.vmem [shape: bf16[256,128], index: 3, kind: input, shape index: {}]   ;;  %s1809_s4 = inlined_call_operand.vmem [shape: f32[1,128], index: 4, kind: input, shape index: {}]   ;;  %s1810_s5 = inlined_call_operand.vmem [shape: bf16[256,128], index: 5, kind: input, shape index: {}]   ;;  %s1811_s6 = inlined_call_operand.vmem [shape: f32[1,128], index: 6, kind: input, shape index: {}]   ;;  %s1812_s7 = inlined_call_operand.vmem [shape: f32[128,128], index: 7, kind: output, shape index: {}]  }
   0x1   :  { %v1374_v0 = vld [vmem:[%s1805_s2 + $0x38] sm:$0xff]  ;;  %1325 = vset.pattern.permute.xlu0 %v1330_v1  ;;  %1326 = vset.pattern.permute.xlu1 %v1330_v1  ;;  %v50_v2 = vld [vmem:[%s1806_s1 + $0x40] sm:$0xff]  ;;  %v1384_v3 = vld [vmem:[%s1805_s2 + $0x30] sm:$0xff] }
   0x2   :  { %1327 = vset.pattern.permute.xlu2 %v1330_v1  ;;  %203 = vmatpush.bf16.msra.mxu0 %v1374_v0  ;;  %v52_v4 = vld [vmem:[%s1806_s1 + $0x50] sm:$0xff]  ;;  %v1394_v5 = vld [vmem:[%s1805_s2 + $0x28] sm:$0xff]  ;;  %v1404_v7 = vld [vmem:[%s1805_s2 + $0x20] sm:$0xff] }
   0x3   :  { %1308 = vmatpush.bf16.msra.mxu2 %v1374_v0  ;;  %294 = vperm.xlu0 %1325, %v50_v2   ;;  %v51_v6 = vld [vmem:[%s1806_s1 + $0x48] sm:$0xff]  ;;  %v53_v8 = vld [vmem:[%s1806_s1 + $0x58] sm:$0xff]  ;;  %v54_v10 = vld [vmem:[%s1806_s1 + $0x60] sm:$0xff] }
   0x4   :  { %304 = vperm.xlu1 %1326, %v52_v4   ;;  %v1414_v9 = vld [vmem:[%s1805_s2 + $0x18] sm:$0xff]  ;;  %v1424_v11 = vld [vmem:[%s1805_s2 + $0x10] sm:$0xff]  ;;  %v55_v12 = vld [vmem:[%s1806_s1 + $0x68] sm:$0xff] }
   0x5   :  { %v1434_v13 = vld [vmem:[%s1805_s2 + $0x8] sm:$0xff]  ;;  %v45_v14 = vld [vmem:[%s1806_s1 + $0x18] sm:$0xff]  ;;  %v1268_v15 = vld [vmem:[%s1805_s2] sm:$0xff] }
   0x6   :  { %204 = vmatpush.bf16.msra.mxu0 %v1384_v3  ;;  %v56_v16 = vld [vmem:[%s1806_s1 + $0x70] sm:$0xff]  ;;  %v1450_v17 = vld [vmem:[%s1807_s0] sm:$0xff]  ;;  %v1291_v21 = vld [vmem:[%s1808_s3 + $0x78] sm:$0xff] }
   0x7   :  { %1309 = vmatpush.bf16.msra.mxu2 %v1384_v3  ;;  %v1455_v18 = vld [vmem:[%s1807_s0 + $0x20] sm:$0xff]  ;;  %v47_v22 = vld [vmem:[%s1806_s1 + $0x28] sm:$0xff]  ;;  %v49_v24 = vld [vmem:[%s1806_s1 + $0x38] sm:$0xff] }
   0x8   :  { %v42_v19 = vld [vmem:[%s1806_s1] sm:$0xff]  ;;  %v43_v23 = vld [vmem:[%s1806_s1 + $0x8] sm:$0xff]  ;;  %v44_v27 = vld [vmem:[%s1806_s1 + $0x10] sm:$0xff] }
   0x9   :  { %v46_v20 = vld [vmem:[%s1806_s1 + $0x20] sm:$0xff]  ;;  %254 = vperm.xlu2 %1327, %v42_v19   ;;  %v1480_v25 = vld [vmem:[%s1807_s0 + $0x8] sm:$0xff]  ;;  %v1290_v28 = vld [vmem:[%s1808_s3 + $0x70] sm:$0xff] }
   0xa   :  { %205 = vmatpush.bf16.msra.mxu0 %v1394_v5  ;;  %v1485_v26 = vld [vmem:[%s1807_s0 + $0x28] sm:$0xff]  ;;  %v57_v30 = vld [vmem:[%s1806_s1 + $0x78] sm:$0xff]  ;;  %v1288_v31 = vld [vmem:[%s1808_s3 + $0x60] sm:$0xff] }
   0xb   :  { %1310 = vmatpush.bf16.msra.mxu2 %v1394_v5  ;;  %299 = vperm.xlu0 %1325, %v51_v6   ;;  %v1289_v29 = vld [vmem:[%s1808_s3 + $0x68] sm:$0xff]  ;;  %v1287_v32 = vld [vmem:[%s1808_s3 + $0x58] sm:$0xff]  ;;  %v1510_v33 = vld [vmem:[%s1807_s0 + $0x10] sm:$0xff] }
   0xc   :  { %309 = vperm.xlu1 %1326, %v53_v8   ;;  %v1515_v34 = vld [vmem:[%s1807_s0 + $0x30] sm:$0xff]  ;;  %v1285_v37 = vld [vmem:[%s1808_s3 + $0x48] sm:$0xff]  ;;  %v1284_v38 = vld [vmem:[%s1808_s3 + $0x40] sm:$0xff] }
   0xd   :  { %v48_v35 = vld [vmem:[%s1806_s1 + $0x30] sm:$0xff]  ;;  %v1534_v39 = vld [vmem:[%s1807_s0 + $0x18] sm:$0xff]  ;;  %v1281_v43 = vld [vmem:[%s1808_s3 + $0x28] sm:$0xff] }
   0xe   :  { %206 = vmatpush.bf16.msra.mxu0 %v1404_v7  ;;  %v1286_v36 = vld [vmem:[%s1808_s3 + $0x50] sm:$0xff]  ;;  %v1539_v40 = vld [vmem:[%s1807_s0 + $0x38] sm:$0xff]  ;;  %v1280_v44 = vld [vmem:[%s1808_s3 + $0x20] sm:$0xff] }
   0xf   :  { %1311 = vmatpush.bf16.msra.mxu2 %v1404_v7  ;;  %v1283_v41 = vld [vmem:[%s1808_s3 + $0x38] sm:$0xff]  ;;  %v1282_v42 = vld [vmem:[%s1808_s3 + $0x30] sm:$0xff]  ;;  %v1277_v47 = vld [vmem:[%s1808_s3 + $0x8] sm:$0xff] }
  0x10   :  { %511 = vmatpush.bf16.msra.mxu1 %v1283_v41  ;;  %1316 = vmatpush.bf16.msra.mxu3 %v1283_v41  ;;  %v1279_v45 = vld [vmem:[%s1808_s3 + $0x18] sm:$0xff]  ;;  %v1278_v46 = vld [vmem:[%s1808_s3 + $0x10] sm:$0xff]  ;;  %v1276_v48 = vld [vmem:[%s1808_s3] sm:$0xff] }
  0x11   :  { %259 = vperm.xlu2 %1327, %v43_v23  }
  0x12   :  { %207 = vmatpush.bf16.msra.mxu0 %v1414_v9 }
  0x13   :  { %1312 = vmatpush.bf16.msra.mxu2 %v1414_v9  ;;  %314 = vperm.xlu0 %1325, %v54_v10  }
  0x14   :  { %319 = vperm.xlu1 %1326, %v55_v12   ;;  %512 = vmatpush.bf16.msra.mxu1 %v1282_v42 }
  0x15   :  { %1317 = vmatpush.bf16.msra.mxu3 %v1282_v42 }
  0x16   :  { %208 = vmatpush.bf16.msra.mxu0 %v1424_v11 }
  0x17   :  { %1313 = vmatpush.bf16.msra.mxu2 %v1424_v11 }
  0x18   :  { %513 = vmatpush.bf16.msra.mxu1 %v1281_v43 }
  0x19   :  { %264 = vperm.xlu2 %1327, %v44_v27   ;;  %1318 = vmatpush.bf16.msra.mxu3 %v1281_v43 }
  0x1a   :  { %209 = vmatpush.bf16.msra.mxu0 %v1434_v13 }
  0x1b   :  { %1314 = vmatpush.bf16.msra.mxu2 %v1434_v13  ;;  %269 = vperm.xlu0 %1325, %v45_v14  }
  0x1c   :  { %324 = vperm.xlu1 %1326, %v56_v16   ;;  %514 = vmatpush.bf16.msra.mxu1 %v1280_v44 }
  0x1d   :  { %1319 = vmatpush.bf16.msra.mxu3 %v1280_v44 }
  0x1e   :  { %210 = vmatpush.bf16.msra.mxu0 %v1268_v15 }
  0x1f   :  { %1315 = vmatpush.bf16.msra.mxu2 %v1268_v15 }
  0x20   :  { %515 = vmatpush.bf16.msra.mxu1 %v1279_v45 }
  0x21   :  { %211 = vmatmul.bf16.vlgmr.msra.gmra.mxu0 %v1450_v17  ;;  %329 = vperm.xlu2 %1327, %v57_v30  }
  0x22   :  { %231 = vmatmul.bf16.vlgmr.msra.gmra.mxu2 %v1455_v18  ;;  %1320 = vmatpush.bf16.msra.mxu3 %v1279_v45 }
  0x23   :  { %274 = vperm.xlu0 %1325, %v46_v20   ;;  %560 = vmatpush.bf16.msrb.mxu2 %v1291_v21 }
  0x24   :  { %279 = vperm.xlu1 %1326, %v47_v22   ;;  %516 = vmatpush.bf16.msra.mxu1 %v1278_v46 }
  0x26   :  { %1321 = vmatpush.bf16.msra.mxu3 %v1278_v46 }
  0x27   :  { %561 = vmatpush.bf16.msrb.mxu2 %v1290_v28 }
  0x28   :  { %517 = vmatpush.bf16.msra.mxu1 %v1277_v47 }
  0x29   :  { %284 = vperm.xlu2 %1327, %v48_v35  }
  0x2a   :  { %1322 = vmatpush.bf16.msra.mxu3 %v1277_v47 }
  0x2b   :  { %289 = vperm.xlu0 %1325, %v49_v24   ;;  %562 = vmatpush.bf16.msrb.mxu2 %v1289_v29 }
  0x2c   :  { %518 = vmatpush.bf16.msra.mxu1 %v1276_v48 }
  0x2e   :  { %1323 = vmatpush.bf16.msra.mxu3 %v1276_v48 }
  0x2f   :  { %563 = vmatpush.bf16.msrb.mxu2 %v1288_v31 }
  0x31   :  { %216 = vmatmul.bf16.gmra.mxu0 %v1480_v25 }
  0x32   :  { %236 = vmatmul.bf16.gmra.mxu2 %v1485_v26 }
  0x33   :  { %564 = vmatpush.bf16.msrb.mxu2 %v1287_v32 }
  0x37   :  { %565 = vmatpush.bf16.msrb.mxu2 %v1286_v36 }
  0x3b   :  { %566 = vmatpush.bf16.msrb.mxu2 %v1285_v37 }
  0x3f   :  { %567 = vmatpush.bf16.msrb.mxu2 %v1284_v38 }
  0x41   :  { %221 = vmatmul.bf16.gmra.mxu0 %v1510_v33 }
  0x42   :  { %241 = vmatmul.bf16.gmra.mxu2 %v1515_v34 }
  0x51   :  { %226 = vmatmul.bf16.gmra.mxu0 %v1534_v39 }
  0x52   :  { %246 = vmatmul.bf16.gmra.mxu2 %v1539_v40 }
  0x62   :  { %568 = vmatmul.bf16.vlgmr.msrb.gmra.mxu2 %v1268_v15 }
  0x63   :  { %v1572_v50 = vpop.permute.xlu2 %254 }
  0x6b   :  { %v1580_v57 = vpop.permute.xlu2 %259 }
  0x72   :  { %573 = vmatmul.bf16.gmra.mxu2 %v1434_v13 }
  0x75   :  { %v1570_v49 = vpop.permute.xlu0 %294 }
  0x76   :  { %v1574_v51 = vpop.permute.xlu1 %304 }
  0x7d   :  { %v1578_v54 = vpop.permute.xlu0 %299 }
  0x7e   :  { %v1583_v60 = vpop.permute.xlu1 %309 }
  0x82   :  { %578 = vmatmul.bf16.gmra.mxu2 %v1424_v11  ;;  %v1589_v11 = vpop.permute.xlu2 %264 }
  0x85   :  { %v1586_v2 = vpop.permute.xlu0 %314 }
  0x86   :  { %v1593_v15 = vpop.permute.xlu1 %319 }
  0x8d   :  { %v1595_v21 = vpop.permute.xlu0 %269 }
  0x8e   :  { %v1599_v30 = vpop.permute.xlu1 %324 }
  0x92   :  { %583 = vmatmul.bf16.gmra.mxu2 %v1414_v9 }
  0x95   :  { %v1603_v42 = vpop.permute.xlu0 %274 }
  0x96   :  { %v1606_v46 = vpop.permute.xlu1 %279 }
  0x9e   :  { %v212_v52 = vpop.f32.mrf.mxu0 }
  0x9f   :  { %v332_v53 = vmul.f32 %v1572_v50, %v212_v52 }
  0xa1   :  { %v348_v56 = vpack.c.bf16 %v332_v53, %v332_v53  ;;  %v1609_v53 = vpop.permute.xlu2 %329 }
  0xa2   :  { %588 = vmatmul.bf16.gmra.mxu2 %v1404_v7 }
  0xa3   :  { %v380_v61 = vunpack.c.l.b16 %v348_v56 }
  0xa5   :  { %v232_v55 = vpop.f32.mrf.mxu2 }
  0xa6   :  { %v214_v58 = vpop.f32.mrf.mxu0  ;;  %v340_v62 = vmul.f32 %v1570_v49, %v232_v55 }
  0xa7   :  { %v333_v59 = vmul.f32 %v1580_v57, %v214_v58 }
  0xa8   :  { %v356_v6 = vpack.c.bf16 %v340_v62, %v340_v62 }
  0xa9   :  { %v349_v63 = vpack.c.bf16 %v333_v59, %v333_v59 }
  0xaa   :  { %v388_v12 = vunpack.c.l.b16 %v356_v6 }
  0xab   :  { %v381_v1 = vunpack.c.l.b16 %v349_v63 }
  0xad   :  { %v234_v4 = vpop.f32.mrf.mxu2  ;;  %v396_v8 = vpack.c.b16 %v381_v1, %v380_v61 }
  0xae   :  { %v341_v7 = vmul.f32 %v1578_v54, %v234_v4  ;;  %v217_v9 = vpop.f32.mrf.mxu0 }
  0xaf   :  { %519 = vmatmul.bf16.vlgmr.msra.gmra.mxu1 %v396_v8  ;;  %v334_v14 = vmul.f32 %v1589_v11, %v217_v9  ;;  %v1614_v8 = vpop.permute.xlu2 %284 }
  0xb0   :  { %v357_v10 = vpack.c.bf16 %v341_v7, %v341_v7 }
  0xb1   :  { %v350_v20 = vpack.c.bf16 %v334_v14, %v334_v14 }
  0xb2   :  { %v389_v13 = vunpack.c.l.b16 %v357_v10  ;;  %593 = vmatmul.bf16.gmra.mxu2 %v1394_v5 }
  0xb3   :  { %v382_v24 = vunpack.c.l.b16 %v350_v20 }
  0xb4   :  { %v400_v16 = vpack.c.b16 %v389_v13, %v388_v12  ;;  %v1617_v13 = vpop.permute.xlu0 %289 }
  0xb5   :  { %v237_v19 = vpop.f32.mrf.mxu2 }
  0xb6   :  { %539 = vmatmul.bf16.vlgmr.msra.gmra.mxu3 %v400_v16  ;;  %v219_v22 = vpop.f32.mrf.mxu0  ;;  %v342_v27 = vmul.f32 %v1574_v51, %v237_v19 }
  0xb7   :  { %v335_v23 = vmul.f32 %v1595_v21, %v219_v22 }
  0xb8   :  { %v358_v5 = vpack.c.bf16 %v342_v27, %v342_v27 }
  0xb9   :  { %v351_v28 = vpack.c.bf16 %v335_v23, %v335_v23 }
  0xba   :  { %v390_v38 = vunpack.c.l.b16 %v358_v5 }
  0xbb   :  { %v383_v29 = vunpack.c.l.b16 %v351_v28 }
  0xbd   :  { %v239_v31 = vpop.f32.mrf.mxu2  ;;  %v397_v35 = vpack.c.b16 %v383_v29, %v382_v24 }
  0xbe   :  { %v343_v32 = vmul.f32 %v1583_v60, %v239_v31  ;;  %v222_v36 = vpop.f32.mrf.mxu0 }
  0xbf   :  { %524 = vmatmul.bf16.gmra.mxu1 %v397_v35  ;;  %v336_v43 = vmul.f32 %v1603_v42, %v222_v36 }
  0xc0   :  { %v359_v37 = vpack.c.bf16 %v343_v32, %v343_v32 }
  0xc1   :  { %v352_v48 = vpack.c.bf16 %v336_v43, %v336_v43  ;;  %v1306_v43 = vld [vmem:[%s1810_s5 + $0x70] sm:$0xff] }
  0xc2   :  { %v391_v41 = vunpack.c.l.b16 %v359_v37  ;;  %598 = vmatmul.bf16.gmra.mxu2 %v1384_v3 }
  0xc3   :  { %v384_v58 = vunpack.c.l.b16 %v352_v48  ;;  %v1304_v48 = vld [vmem:[%s1810_s5 + $0x60] sm:$0xff] }
  0xc4   :  { %v401_v44 = vpack.c.b16 %v391_v41, %v390_v38  ;;  %v1307_v41 = vld [vmem:[%s1810_s5 + $0x78] sm:$0xff] }
  0xc5   :  { %v242_v45 = vpop.f32.mrf.mxu2  ;;  %999 = vmatpush.bf16.msrb.mxu1 %v1307_v41 }
  0xc6   :  { %544 = vmatmul.bf16.gmra.mxu3 %v401_v44  ;;  %v224_v47 = vpop.f32.mrf.mxu0  ;;  %v344_v55 = vmul.f32 %v1586_v2, %v242_v45  ;;  %v1305_v45 = vld [vmem:[%s1810_s5 + $0x68] sm:$0xff] }
  0xc7   :  { %v337_v52 = vmul.f32 %v1606_v46, %v224_v47 }
  0xc8   :  { %v360_v61 = vpack.c.bf16 %v344_v55, %v344_v55  ;;  %v1303_v55 = vld [vmem:[%s1810_s5 + $0x58] sm:$0xff] }
  0xc9   :  { %v353_v56 = vpack.c.bf16 %v337_v52, %v337_v52  ;;  %1000 = vmatpush.bf16.msrb.mxu1 %v1306_v43 }
  0xca   :  { %v392_v6 = vunpack.c.l.b16 %v360_v61 }
  0xcb   :  { %v385_v3 = vunpack.c.l.b16 %v353_v56  ;;  %v1302_v56 = vld [vmem:[%s1810_s5 + $0x50] sm:$0xff] }
  0xcd   :  { %v244_v59 = vpop.f32.mrf.mxu2  ;;  %v398_v63 = vpack.c.b16 %v385_v3, %v384_v58  ;;  %1001 = vmatpush.bf16.msrb.mxu1 %v1305_v45  ;;  %v1301_v3 = vld [vmem:[%s1810_s5 + $0x48] sm:$0xff] }
  0xce   :  { %v345_v62 = vmul.f32 %v1593_v15, %v244_v59  ;;  %v227_v1 = vpop.f32.mrf.mxu0  ;;  %v1300_v59 = vld [vmem:[%s1810_s5 + $0x40] sm:$0xff] }
  0xcf   :  { %529 = vmatmul.bf16.gmra.mxu1 %v398_v63  ;;  %v338_v9 = vmul.f32 %v1614_v8, %v227_v1 }
  0xd0   :  { %v361_v4 = vpack.c.bf16 %v345_v62, %v345_v62  ;;  %v1649_v62 = vld [vmem:[%s1809_s4] ss:$0 sm:$0xff] }
  0xd1   :  { %v354_v16 = vpack.c.bf16 %v338_v9, %v338_v9  ;;  %1002 = vmatpush.bf16.msrb.mxu1 %v1304_v48 }
  0xd2   :  { %v393_v7 = vunpack.c.l.b16 %v361_v4  ;;  %603 = vmatmul.bf16.gmra.mxu2 %v1374_v0 }
  0xd3   :  { %v386_v23 = vunpack.c.l.b16 %v354_v16 }
  0xd4   :  { %v402_v10 = vpack.c.b16 %v393_v7, %v392_v6 }
  0xd5   :  { %v247_v12 = vpop.f32.mrf.mxu2  ;;  %1003 = vmatpush.bf16.msrb.mxu1 %v1303_v55 }
  0xd6   :  { %549 = vmatmul.bf16.gmra.mxu3 %v402_v10  ;;  %v229_v14 = vpop.f32.mrf.mxu0  ;;  %v346_v20 = vmul.f32 %v1599_v30, %v247_v12 }
  0xd7   :  { %v339_v19 = vmul.f32 %v1617_v13, %v229_v14 }
  0xd8   :  { %v362_v0 = vpack.c.bf16 %v346_v20, %v346_v20 }
  0xd9   :  { %v355_v22 = vpack.c.bf16 %v339_v19, %v339_v19  ;;  %1004 = vmatpush.bf16.msrb.mxu1 %v1302_v56 }
  0xda   :  { %v394_v5 = vunpack.c.l.b16 %v362_v0 }
  0xdb   :  { %v387_v24 = vunpack.c.l.b16 %v355_v22 }
  0xdd   :  { %v249_v27 = vpop.f32.mrf.mxu2  ;;  %v399_v29 = vpack.c.b16 %v387_v24, %v386_v23  ;;  %1005 = vmatpush.bf16.msrb.mxu1 %v1301_v3 }
  0xde   :  { %v347_v28 = vmul.f32 %v1609_v53, %v249_v27 }
  0xdf   :  { %534 = vmatmul.bf16.gmra.mxu1 %v399_v29 }
  0xe0   :  { %v363_v31 = vpack.c.bf16 %v347_v28, %v347_v28 }
  0xe1   :  { %1006 = vmatpush.bf16.msrb.mxu1 %v1300_v59 }
  0xe2   :  { %v395_v32 = vunpack.c.l.b16 %v363_v31 }
  0xe4   :  { %v403_v35 = vpack.c.b16 %v395_v32, %v394_v5 }
  0xe5   :  { %v569_v36 = vpop.f32.mrf.mxu2 }
  0xe6   :  { %554 = vmatmul.bf16.gmra.mxu3 %v403_v35 }
  0xed   :  { %v571_v37 = vpop.f32.mrf.mxu2 }
  0xf5   :  { %v574_v38 = vpop.f32.mrf.mxu2 }
  0xfd   :  { %v576_v44 = vpop.f32.mrf.mxu2 }
 0x105   :  { %v579_v47 = vpop.f32.mrf.mxu2 }
 0x10d   :  { %v581_v52 = vpop.f32.mrf.mxu2 }
 0x115   :  { %v584_v58 = vpop.f32.mrf.mxu2 }
 0x11d   :  { %v586_v61 = vpop.f32.mrf.mxu2 }
 0x125   :  { %v1651_v1 = vpop.f32.mrf.mxu2 }
 0x12c   :  { %v520_v63 = vpop.f32.mrf.mxu1 }
 0x12d   :  { %v521_v4 = vadd.f32 %v1649_v62, %v520_v63  ;;  %v1655_v12 = vpop.f32.mrf.mxu2 }
 0x12f   :  { %v570_v6 = vadd.f32 %v569_v36, %v521_v4 }
 0x131   :  { %v609_v9 = vmax.f32 %v570_v6, 0.0 }
 0x133   :  { %v625_v19 = vpack.c.bf16 %v609_v9, %v609_v9 }
 0x134   :  { %v522_v7 = vpop.f32.mrf.mxu1 }
 0x135   :  { %v523_v10 = vadd.f32 %v1649_v62, %v522_v7  ;;  %v690_v24 = vunpack.c.l.b16 %v625_v19  ;;  %v1660_v31 = vpop.f32.mrf.mxu2 }
 0x137   :  { %v572_v14 = vadd.f32 %v571_v37, %v523_v10 }
 0x139   :  { %v540_v16 = vpop.f32.mrf.mxu3  ;;  %v610_v20 = vmax.f32 %v572_v14, 0.0 }
 0x13b   :  { %v626_v22 = vpack.c.bf16 %v610_v20, %v610_v20 }
 0x13c   :  { %v525_v23 = vpop.f32.mrf.mxu1 }
 0x13d   :  { %v691_v27 = vunpack.c.l.b16 %v626_v22  ;;  %v526_v0 = vadd.f32 %v1649_v62, %v525_v23  ;;  %v596_v48 = vpop.f32.mrf.mxu2 }
 0x13f   :  { %v1658_v28 = vpack.c.b16 %v691_v27, %v690_v24  ;;  %v575_v5 = vadd.f32 %v574_v38, %v526_v0 }
 0x141   :  { %v542_v29 = vpop.f32.mrf.mxu3  ;;  %1007 = vmatmul.bf16.vlgmr.msrb.gmra.mxu1 %v1658_v28  ;;  %v611_v35 = vmax.f32 %v575_v5, 0.0 }
 0x143   :  { %v627_v43 = vpack.c.bf16 %v611_v35, %v611_v35 }
 0x144   :  { %v527_v32 = vpop.f32.mrf.mxu1 }
 0x145   :  { %v528_v36 = vadd.f32 %v1649_v62, %v527_v32  ;;  %v692_v59 = vunpack.c.l.b16 %v627_v43  ;;  %v599_v7 = vpop.f32.mrf.mxu2 }
 0x147   :  { %v577_v37 = vadd.f32 %v576_v44, %v528_v36 }
 0x149   :  { %v545_v41 = vpop.f32.mrf.mxu3  ;;  %v612_v45 = vmax.f32 %v577_v37, 0.0 }
 0x14b   :  { %v628_v55 = vpack.c.bf16 %v612_v45, %v612_v45 }
 0x14c   :  { %v530_v56 = vpop.f32.mrf.mxu1 }
 0x14d   :  { %v531_v3 = vadd.f32 %v1649_v62, %v530_v56  ;;  %v693_v63 = vunpack.c.l.b16 %v628_v55  ;;  %v601_v32 = vpop.f32.mrf.mxu2 }
 0x14f   :  { %v1665_v4 = vpack.c.b16 %v693_v63, %v692_v59  ;;  %v580_v6 = vadd.f32 %v579_v47, %v531_v3 }
 0x151   :  { %v547_v38 = vpop.f32.mrf.mxu3  ;;  %1012 = vmatmul.bf16.gmra.mxu1 %v1665_v4  ;;  %v613_v10 = vmax.f32 %v580_v6, 0.0  ;;  %v543_v6 = vadd.f32 %v1649_v62, %v542_v29  ;;  %v546_v29 = vadd.f32 %v1649_v62, %v545_v41 }
 0x153   :  { %v629_v20 = vpack.c.bf16 %v613_v10, %v613_v10 }
 0x154   :  { %v532_v9 = vpop.f32.mrf.mxu1 }
 0x155   :  { %v533_v44 = vadd.f32 %v1649_v62, %v532_v9  ;;  %v694_v0 = vunpack.c.l.b16 %v629_v20  ;;  %v604_v55 = vpop.f32.mrf.mxu2 }
 0x157   :  { %v582_v14 = vadd.f32 %v581_v52, %v533_v44 }
 0x159   :  { %v550_v19 = vpop.f32.mrf.mxu3  ;;  %v614_v22 = vmax.f32 %v582_v14, 0.0 }
 0x15a   :  { %v551_v44 = vadd.f32 %v1649_v62, %v550_v19 }
 0x15b   :  { %v630_v23 = vpack.c.bf16 %v614_v22, %v614_v22 }
 0x15c   :  { %v535_v24 = vpop.f32.mrf.mxu1 }
 0x15d   :  { %v536_v27 = vadd.f32 %v1649_v62, %v535_v24  ;;  %v695_v5 = vunpack.c.l.b16 %v630_v23  ;;  %v548_v23 = vadd.f32 %v1649_v62, %v547_v38  ;;  %v606_v19 = vpop.f32.mrf.mxu2  ;;  %v595_v38 = vadd.f32 %v1660_v31, %v546_v29 }
 0x15f   :  { %v1670_v35 = vpack.c.b16 %v695_v5, %v694_v0  ;;  %v585_v36 = vadd.f32 %v584_v58, %v536_v27  ;;  %v541_v58 = vadd.f32 %v1649_v62, %v540_v16 }
 0x161   :  { %v552_v47 = vpop.f32.mrf.mxu3  ;;  %1017 = vmatmul.bf16.gmra.mxu1 %v1670_v35  ;;  %v615_v43 = vmax.f32 %v585_v36, 0.0  ;;  %v590_v0 = vadd.f32 %v1651_v1, %v541_v58 }
 0x162   :  { %v553_v9 = vadd.f32 %v1649_v62, %v552_v47  ;;  %v600_v47 = vadd.f32 %v599_v7, %v551_v44 }
 0x163   :  { %v631_v3 = vpack.c.bf16 %v615_v43, %v615_v43  ;;  %v597_v43 = vadd.f32 %v596_v48, %v548_v23 }
 0x164   :  { %v537_v37 = vpop.f32.mrf.mxu1  ;;  %v602_v24 = vadd.f32 %v601_v32, %v553_v9  ;;  %v621_v32 = vmax.f32 %v600_v47, 0.0 }
 0x165   :  { %v538_v52 = vadd.f32 %v1649_v62, %v537_v37  ;;  %v696_v20 = vunpack.c.l.b16 %v631_v3  ;;  %v620_v3 = vmax.f32 %v597_v43, 0.0 }
 0x167   :  { %v587_v45 = vadd.f32 %v586_v61, %v538_v52  ;;  %v592_v61 = vadd.f32 %v1655_v12, %v543_v6  ;;  %v622_v52 = vmax.f32 %v602_v24, 0.0  ;;  %v617_v12 = vmax.f32 %v590_v0, 0.0 }
 0x168   :  { %v637_v6 = vpack.c.bf16 %v621_v32, %v621_v32 }
 0x169   :  { %v555_v56 = vpop.f32.mrf.mxu3  ;;  %v616_v59 = vmax.f32 %v587_v45, 0.0  ;;  %v618_v37 = vmax.f32 %v592_v61, 0.0  ;;  %v633_v7 = vpack.c.bf16 %v617_v12, %v617_v12 }
 0x16a   :  { %v556_v63 = vadd.f32 %v1649_v62, %v555_v56 }
 0x16b   :  { %v632_v10 = vpack.c.bf16 %v616_v59, %v616_v59  ;;  %v634_v1 = vpack.c.bf16 %v618_v37, %v618_v37  ;;  %v638_v59 = vpack.c.bf16 %v622_v52, %v622_v52  ;;  %v698_v31 = vunpack.c.l.b16 %v633_v7 }
 0x16c   :  { %v605_v14 = vadd.f32 %v604_v55, %v556_v63  ;;  %v619_v63 = vmax.f32 %v595_v38, 0.0 }
 0x16d   :  { %v697_v22 = vunpack.c.l.b16 %v632_v10  ;;  %v636_v10 = vpack.c.bf16 %v620_v3, %v620_v3  ;;  %v703_v48 = vunpack.c.l.b16 %v638_v59  ;;  %v699_v44 = vunpack.c.l.b16 %v634_v1 }
 0x16e   :  { %v623_v36 = vmax.f32 %v605_v14, 0.0  ;;  %v635_v14 = vpack.c.bf16 %v619_v63, %v619_v63 }
 0x16f   :  { %v709_v27 = vpack.c.b16 %v697_v22, %v696_v20  ;;  %v702_v20 = vunpack.c.l.b16 %v637_v6  ;;  %v710_v61 = vpack.c.b16 %v699_v44, %v698_v31  ;;  %v701_v23 = vunpack.c.l.b16 %v636_v10 }
 0x170   :  { %v639_v55 = vpack.c.bf16 %v623_v36, %v623_v36  ;;  %v700_v24 = vunpack.c.l.b16 %v635_v14 }
 0x171   :  { %v557_v5 = vpop.f32.mrf.mxu3  ;;  %1022 = vmatmul.bf16.gmra.mxu1 %v709_v27  ;;  %v712_v22 = vpack.c.b16 %v703_v48, %v702_v20 }
 0x172   :  { %v558_v16 = vadd.f32 %v1649_v62, %v557_v5  ;;  %v704_v62 = vunpack.c.l.b16 %v639_v55  ;;  %v711_v0 = vpack.c.b16 %v701_v23, %v700_v24 }
 0x174   :  { %v607_v45 = vadd.f32 %v606_v19, %v558_v16 }
 0x176   :  { %v624_v56 = vmax.f32 %v607_v45, 0.0 }
 0x178   :  { %v640_v41 = vpack.c.bf16 %v624_v56, %v624_v56 }
 0x17a   :  { %v705_v9 = vunpack.c.l.b16 %v640_v41 }
 0x17c   :  { %v713_v58 = vpack.c.b16 %v705_v9, %v704_v62 }
 0x17e   :  { %722 = vmatpush.bf16.msrb.mxu3 %v713_v58 }
 0x181   :  { %1027 = vmatmul.bf16.gmra.mxu1 %v710_v61 }
 0x182   :  { %723 = vmatpush.bf16.msrb.mxu3 %v712_v22 }
 0x186   :  { %724 = vmatpush.bf16.msrb.mxu3 %v711_v0 }
 0x18a   :  { %725 = vmatpush.bf16.msrb.mxu3 %v710_v61 }
 0x18e   :  { %726 = vmatpush.bf16.msrb.mxu3 %v709_v27 }
 0x191   :  { %1032 = vmatmul.bf16.gmra.mxu1 %v711_v0 }
 0x192   :  { %727 = vmatpush.bf16.msrb.mxu3 %v1670_v35 }
 0x196   :  { %728 = vmatpush.bf16.msrb.mxu3 %v1665_v4  ;;  %v1299_v4 = vld [vmem:[%s1810_s5 + $0x38] sm:$0xff] }
 0x197   :  { %950 = vmatpush.bf16.msrb.mxu0 %v1299_v4 }
 0x19a   :  { %729 = vmatpush.bf16.msrb.mxu3 %v1658_v28 }
 0x19d   :  { %730 = vmatmul.bf16.vlgmr.msrb.gmra.mxu3 %v1450_v17  ;;  %v1298_v17 = vld [vmem:[%s1810_s5 + $0x30] sm:$0xff] }
 0x19e   :  { %951 = vmatpush.bf16.msrb.mxu0 %v1298_v17 }
 0x1a1   :  { %1037 = vmatmul.bf16.gmra.mxu1 %v712_v22 }
 0x1ad   :  { %735 = vmatmul.bf16.gmra.mxu3 %v1480_v25  ;;  %v1297_v25 = vld [vmem:[%s1810_s5 + $0x28] sm:$0xff] }
 0x1ae   :  { %952 = vmatpush.bf16.msrb.mxu0 %v1297_v25 }
 0x1b1   :  { %1042 = vmatmul.bf16.gmra.mxu1 %v713_v58 }
 0x1bd   :  { %740 = vmatmul.bf16.gmra.mxu3 %v1510_v33  ;;  %v1294_v33 = vld [vmem:[%s1810_s5 + $0x10] sm:$0xff] }
 0x1cd   :  { %745 = vmatmul.bf16.gmra.mxu3 %v1534_v39  ;;  %v1293_v39 = vld [vmem:[%s1810_s5 + $0x8] sm:$0xff] }
 0x1dd   :  { %750 = vmatmul.bf16.gmra.mxu3 %v1455_v18  ;;  %v1296_v18 = vld [vmem:[%s1810_s5 + $0x20] sm:$0xff] }
 0x1de   :  { %953 = vmatpush.bf16.msrb.mxu0 %v1296_v18 }
 0x1ed   :  { %755 = vmatmul.bf16.gmra.mxu3 %v1485_v26  ;;  %v1295_v26 = vld [vmem:[%s1810_s5 + $0x18] sm:$0xff] }
 0x1ee   :  { %954 = vmatpush.bf16.msrb.mxu0 %v1295_v26 }
 0x1f2   :  { %955 = vmatpush.bf16.msrb.mxu0 %v1294_v33 }
 0x1f6   :  { %956 = vmatpush.bf16.msrb.mxu0 %v1293_v39 }
 0x1fd   :  { %760 = vmatmul.bf16.gmra.mxu3 %v1515_v34  ;;  %v1292_v34 = vld [vmem:[%s1810_s5] sm:$0xff] }
 0x1fe   :  { %957 = vmatpush.bf16.msrb.mxu0 %v1292_v34 }
 0x20d   :  { %765 = vmatmul.bf16.gmra.mxu3 %v1539_v40 }
 0x220   :  { %v731_v28 = vpop.f32.mrf.mxu3 }
 0x221   :  { %v771_v35 = vmul.f32 %v731_v28, %v1572_v50 }
 0x223   :  { %v787_v5 = vpack.c.bf16 %v771_v35, %v771_v35 }
 0x225   :  { %v819_v36 = vunpack.c.l.b16 %v787_v5 }
 0x228   :  { %v733_v27 = vpop.f32.mrf.mxu3 }
 0x229   :  { %v772_v29 = vmul.f32 %v733_v27, %v1580_v57 }
 0x22b   :  { %v788_v47 = vpack.c.bf16 %v772_v29, %v772_v29 }
 0x22d   :  { %v820_v16 = vunpack.c.l.b16 %v788_v47  ;;  %v1008_v47 = vpop.f32.mrf.mxu1 }
 0x22f   :  { %v835_v19 = vpack.c.b16 %v820_v16, %v819_v36 }
 0x230   :  { %v736_v37 = vpop.f32.mrf.mxu3 }
 0x231   :  { %958 = vmatmul.bf16.vlgmr.msrb.gmra.mxu0 %v835_v19  ;;  %v773_v43 = vmul.f32 %v736_v37, %v1589_v11 }
 0x233   :  { %v789_v45 = vpack.c.bf16 %v773_v43, %v773_v43 }
 0x235   :  { %v821_v38 = vunpack.c.l.b16 %v789_v45  ;;  %v1010_v43 = vpop.f32.mrf.mxu1 }
 0x238   :  { %v738_v52 = vpop.f32.mrf.mxu3 }
 0x239   :  { %v774_v40 = vmul.f32 %v738_v52, %v1595_v21 }
 0x23b   :  { %v790_v12 = vpack.c.bf16 %v774_v40, %v774_v40  ;;  %v1739_v40 = vld [vmem:[%s1811_s6] ss:$0 sm:$0xff] }
 0x23d   :  { %v822_v32 = vunpack.c.l.b16 %v790_v12 }
 0x23f   :  { %v836_v50 = vpack.c.b16 %v822_v32, %v821_v38 }
 0x240   :  { %v741_v55 = vpop.f32.mrf.mxu3 }
 0x241   :  { %963 = vmatmul.bf16.gmra.mxu0 %v836_v50  ;;  %v775_v57 = vmul.f32 %v741_v55, %v1603_v42 }
 0x243   :  { %v791_v1 = vpack.c.bf16 %v775_v57, %v775_v57 }
 0x245   :  { %v823_v41 = vunpack.c.l.b16 %v791_v1 }
 0x248   :  { %v743_v56 = vpop.f32.mrf.mxu3 }
 0x249   :  { %v776_v3 = vmul.f32 %v743_v56, %v1606_v46 }
 0x24b   :  { %v792_v59 = vpack.c.bf16 %v776_v3, %v776_v3 }
 0x24d   :  { %v824_v7 = vunpack.c.l.b16 %v792_v59 }
 0x24f   :  { %v837_v11 = vpack.c.b16 %v824_v7, %v823_v41 }
 0x250   :  { %v746_v63 = vpop.f32.mrf.mxu3 }
 0x251   :  { %968 = vmatmul.bf16.gmra.mxu0 %v837_v11  ;;  %v777_v21 = vmul.f32 %v746_v63, %v1614_v8 }
 0x253   :  { %v793_v62 = vpack.c.bf16 %v777_v21, %v777_v21 }
 0x255   :  { %v825_v58 = vunpack.c.l.b16 %v793_v62 }
 0x258   :  { %v748_v6 = vpop.f32.mrf.mxu3 }
 0x259   :  { %v778_v9 = vmul.f32 %v748_v6, %v1617_v13 }
 0x25b   :  { %v794_v10 = vpack.c.bf16 %v778_v9, %v778_v9 }
 0x25d   :  { %v826_v48 = vunpack.c.l.b16 %v794_v10 }
 0x25f   :  { %v838_v42 = vpack.c.b16 %v826_v48, %v825_v58 }
 0x260   :  { %v751_v44 = vpop.f32.mrf.mxu3 }
 0x261   :  { %973 = vmatmul.bf16.gmra.mxu0 %v838_v42  ;;  %v779_v46 = vmul.f32 %v751_v44, %v1570_v49 }
 0x263   :  { %v795_v20 = vpack.c.bf16 %v779_v46, %v779_v46 }
 0x265   :  { %v827_v61 = vunpack.c.l.b16 %v795_v20 }
 0x268   :  { %v753_v14 = vpop.f32.mrf.mxu3 }
 0x269   :  { %v780_v31 = vmul.f32 %v753_v14, %v1578_v54 }
 0x26b   :  { %v796_v22 = vpack.c.bf16 %v780_v31, %v780_v31 }
 0x26d   :  { %v828_v23 = vunpack.c.l.b16 %v796_v22 }
 0x26f   :  { %v839_v8 = vpack.c.b16 %v828_v23, %v827_v61 }
 0x270   :  { %v756_v24 = vpop.f32.mrf.mxu3 }
 0x271   :  { %978 = vmatmul.bf16.gmra.mxu0 %v839_v8  ;;  %v781_v13 = vmul.f32 %v756_v24, %v1574_v51 }
 0x273   :  { %v797_v4 = vpack.c.bf16 %v781_v13, %v781_v13 }
 0x275   :  { %v829_v18 = vunpack.c.l.b16 %v797_v4 }
 0x278   :  { %v758_v0 = vpop.f32.mrf.mxu3 }
 0x279   :  { %v782_v17 = vmul.f32 %v758_v0, %v1583_v60 }
 0x27b   :  { %v798_v25 = vpack.c.bf16 %v782_v17, %v782_v17 }
 0x27d   :  { %v830_v26 = vunpack.c.l.b16 %v798_v25 }
 0x27f   :  { %v840_v49 = vpack.c.b16 %v830_v26, %v829_v18 }
 0x280   :  { %v761_v33 = vpop.f32.mrf.mxu3 }
 0x281   :  { %983 = vmatmul.bf16.gmra.mxu0 %v840_v49  ;;  %v783_v54 = vmul.f32 %v761_v33, %v1586_v2 }
 0x283   :  { %v799_v34 = vpack.c.bf16 %v783_v54, %v783_v54 }
 0x285   :  { %v831_v27 = vunpack.c.l.b16 %v799_v34 }
 0x288   :  { %v763_v39 = vpop.f32.mrf.mxu3 }
 0x289   :  { %v784_v28 = vmul.f32 %v763_v39, %v1593_v15  ;;  %v1013_v15 = vpop.f32.mrf.mxu1 }
 0x28b   :  { %v800_v35 = vpack.c.bf16 %v784_v28, %v784_v28 }
 0x28d   :  { %v832_v5 = vunpack.c.l.b16 %v800_v35 }
 0x28f   :  { %v841_v51 = vpack.c.b16 %v832_v5, %v831_v27 }
 0x290   :  { %v766_v29 = vpop.f32.mrf.mxu3 }
 0x291   :  { %988 = vmatmul.bf16.gmra.mxu0 %v841_v51  ;;  %v785_v60 = vmul.f32 %v766_v29, %v1599_v30  ;;  %v1015_v30 = vpop.f32.mrf.mxu1 }
 0x293   :  { %v801_v16 = vpack.c.bf16 %v785_v60, %v785_v60 }
 0x295   :  { %v833_v2 = vunpack.c.l.b16 %v801_v16 }
 0x298   :  { %v768_v36 = vpop.f32.mrf.mxu3 }
 0x299   :  { %v786_v19 = vmul.f32 %v768_v36, %v1609_v53  ;;  %v1018_v57 = vpop.f32.mrf.mxu1 }
 0x29b   :  { %v802_v37 = vpack.c.bf16 %v786_v19, %v786_v19 }
 0x29d   :  { %v834_v52 = vunpack.c.l.b16 %v802_v37 }
 0x29f   :  { %v842_v45 = vpack.c.b16 %v834_v52, %v833_v2 }
 0x2a1   :  { %993 = vmatmul.bf16.gmra.mxu0 %v842_v45  ;;  %v1020_v59 = vpop.f32.mrf.mxu1 }
 0x2a9   :  { %v1023_v63 = vpop.f32.mrf.mxu1 }
 0x2ae   :  { %v959_v12 = vpop.f32.mrf.mxu0 }
 0x2af   :  { %v960_v38 = vadd.f32 %v1739_v40, %v959_v12 }
 0x2b1   :  { %v1009_v32 = vadd.f32 %v1008_v47, %v960_v38  ;;  %v1025_v58 = vpop.f32.mrf.mxu1 }
 0x2b3   :  { %1048 = vst [vmem:[%s1812_s7] sm:$0xff] %v1009_v32 }
 0x2b6   :  { %v961_v53 = vpop.f32.mrf.mxu0 }
 0x2b7   :  { %v962_v50 = vadd.f32 %v1739_v40, %v961_v53 }
 0x2b9   :  { %v1011_v55 = vadd.f32 %v1010_v43, %v962_v50  ;;  %v1028_v14 = vpop.f32.mrf.mxu1 }
 0x2bb   :  { %1049 = vst [vmem:[%s1812_s7 + $0x8] sm:$0xff] %v1011_v55 }
 0x2be   :  { %v964_v56 = vpop.f32.mrf.mxu0 }
 0x2bf   :  { %v965_v1 = vadd.f32 %v1739_v40, %v964_v56 }
 0x2c1   :  { %v1014_v3 = vadd.f32 %v1013_v15, %v965_v1  ;;  %v1030_v61 = vpop.f32.mrf.mxu1 }
 0x2c3   :  { %1050 = vst [vmem:[%s1812_s7 + $0x10] sm:$0xff] %v1014_v3 }
 0x2c6   :  { %v966_v41 = vpop.f32.mrf.mxu0 }
 0x2c7   :  { %v967_v7 = vadd.f32 %v1739_v40, %v966_v41 }
 0x2c9   :  { %v1016_v11 = vadd.f32 %v1015_v30, %v967_v7  ;;  %v1033_v13 = vpop.f32.mrf.mxu1 }
 0x2cb   :  { %1051 = vst [vmem:[%s1812_s7 + $0x18] sm:$0xff] %v1016_v11 }
 0x2ce   :  { %v969_v21 = vpop.f32.mrf.mxu0 }
 0x2cf   :  { %v970_v6 = vadd.f32 %v1739_v40, %v969_v21 }
 0x2d1   :  { %v1019_v62 = vadd.f32 %v1018_v57, %v970_v6  ;;  %v1035_v26 = vpop.f32.mrf.mxu1 }
 0x2d3   :  { %1052 = vst [vmem:[%s1812_s7 + $0x20] sm:$0xff] %v1019_v62 }
 0x2d6   :  { %v971_v9 = vpop.f32.mrf.mxu0 }
 0x2d7   :  { %v972_v10 = vadd.f32 %v1739_v40, %v971_v9 }
 0x2d9   :  { %v1021_v48 = vadd.f32 %v1020_v59, %v972_v10  ;;  %v1038_v34 = vpop.f32.mrf.mxu1 }
 0x2db   :  { %1053 = vst [vmem:[%s1812_s7 + $0x28] sm:$0xff] %v1021_v48 }
 0x2de   :  { %v974_v42 = vpop.f32.mrf.mxu0 }
 0x2df   :  { %v975_v44 = vadd.f32 %v1739_v40, %v974_v42 }
 0x2e1   :  { %v1024_v46 = vadd.f32 %v1023_v63, %v975_v44  ;;  %v1040_v5 = vpop.f32.mrf.mxu1 }
 0x2e3   :  { %1054 = vst [vmem:[%s1812_s7 + $0x30] sm:$0xff] %v1024_v46 }
 0x2e6   :  { %v976_v20 = vpop.f32.mrf.mxu0 }
 0x2e7   :  { %v977_v31 = vadd.f32 %v1739_v40, %v976_v20 }
 0x2e9   :  { %v1026_v22 = vadd.f32 %v1025_v58, %v977_v31  ;;  %v1043_v60 = vpop.f32.mrf.mxu1 }
 0x2eb   :  { %1055 = vst [vmem:[%s1812_s7 + $0x38] sm:$0xff] %v1026_v22 }
 0x2ee   :  { %v979_v23 = vpop.f32.mrf.mxu0 }
 0x2ef   :  { %v980_v8 = vadd.f32 %v1739_v40, %v979_v23 }
 0x2f1   :  { %v1029_v24 = vadd.f32 %v1028_v14, %v980_v8  ;;  %v1045_v2 = vpop.f32.mrf.mxu1 }
 0x2f3   :  { %1056 = vst [vmem:[%s1812_s7 + $0x40] sm:$0xff] %v1029_v24 }
 0x2f6   :  { %v981_v0 = vpop.f32.mrf.mxu0 }
 0x2f7   :  { %v982_v4 = vadd.f32 %v1739_v40, %v981_v0 }
 0x2f9   :  { %v1031_v17 = vadd.f32 %v1030_v61, %v982_v4 }
 0x2fb   :  { %1057 = vst [vmem:[%s1812_s7 + $0x48] sm:$0xff] %v1031_v17 }
 0x2fe   :  { %v984_v25 = vpop.f32.mrf.mxu0 }
 0x2ff   :  { %v985_v18 = vadd.f32 %v1739_v40, %v984_v25 }
 0x301   :  { %v1034_v49 = vadd.f32 %v1033_v13, %v985_v18 }
 0x303   :  { %1058 = vst [vmem:[%s1812_s7 + $0x50] sm:$0xff] %v1034_v49 }
 0x306   :  { %v986_v33 = vpop.f32.mrf.mxu0 }
 0x307   :  { %v987_v54 = vadd.f32 %v1739_v40, %v986_v33 }
 0x309   :  { %v1036_v39 = vadd.f32 %v1035_v26, %v987_v54 }
 0x30b   :  { %1059 = vst [vmem:[%s1812_s7 + $0x58] sm:$0xff] %v1036_v39 }
 0x30e   :  { %v989_v28 = vpop.f32.mrf.mxu0 }
 0x30f   :  { %v990_v35 = vadd.f32 %v1739_v40, %v989_v28 }
 0x311   :  { %v1039_v27 = vadd.f32 %v1038_v34, %v990_v35 }
 0x313   :  { %1060 = vst [vmem:[%s1812_s7 + $0x60] sm:$0xff] %v1039_v27 }
 0x316   :  { %v991_v51 = vpop.f32.mrf.mxu0 }
 0x317   :  { %v992_v29 = vadd.f32 %v1739_v40, %v991_v51 }
 0x319   :  { %v1041_v47 = vadd.f32 %v1040_v5, %v992_v29 }
 0x31b   :  { %1061 = vst [vmem:[%s1812_s7 + $0x68] sm:$0xff] %v1041_v47 }
 0x31e   :  { %v994_v36 = vpop.f32.mrf.mxu0 }
 0x31f   :  { %v995_v16 = vadd.f32 %v1739_v40, %v994_v36 }
 0x321   :  { %v1044_v19 = vadd.f32 %v1043_v60, %v995_v16 }
 0x323   :  { %1062 = vst [vmem:[%s1812_s7 + $0x70] sm:$0xff] %v1044_v19 }
 0x326   :  { %v996_v37 = vpop.f32.mrf.mxu0 }
 0x327   :  { %v997_v43 = vadd.f32 %v1739_v40, %v996_v37 }
 0x329   :  { %v1046_v52 = vadd.f32 %v1045_v2, %v997_v43 }
 0x32b   :  { %1063 = vst [vmem:[%s1812_s7 + $0x78] sm:$0xff] %v1046_v52 }

</bundles_post_ra>
